<compile_context>
chip_gen: v5e
topology: v5e:2x2
jax: 0.10.0
libtpu: 0.0.40
codegen_flags: <defaults>
</compile_context>

<pallas_src>
import jax
import jax.numpy as jnp
import numpy as np
from jax.experimental import pallas as pl
from jax.experimental.pallas import tpu as pltpu

_VMEM = pl.BlockSpec(memory_space=pltpu.MemorySpace.VMEM)
_EPS = 1e-5  # torch BatchNorm1d default eps


# ----------------------------------------------------------------------------
# Static (Python-int) size bookkeeping, mirroring the PyTorch __init__
# ----------------------------------------------------------------------------
def _rup(v, m):
    return -(-v // m) * m


def _static_meta(cfg):
    K, stride, pad = cfg["cnn_kernel"], cfg["cnn_stride"], cfg["cnn_padding"]
    C_in, C, L = cfg["in_channels"], cfg["cnn_channel"], cfg["input_dim"]
    conv_out = lambda l: (l - K + 2 * pad) // stride + 1
    L1 = conv_out(L)
    L1p = L1 // 2
    L2 = conv_out(L1p)
    L2p = L2 // 2
    n_hidden, n_units, out_dim = cfg["n_layers"], cfg["n_units"], cfg["output_dim"]
    fc1_out = 128  # hard-coded in the PyTorch module

    d_in1 = C_in * L      # flattened conv1 input features (channel-major)
    d_p1 = L1p * C        # pooled conv1 output features (position-major)
    d_p2 = L2p * C        # pooled conv2 output features (position-major)
    cols = _rup(max(128, d_p1, d_p2, fc1_out, n_units, out_dim), 128)

    # packed weight-slab layout: 8-row-aligned sections, 128-lane columns
    offs, r = {}, 0

    def add(name, rows):
        nonlocal r
        offs[name] = r
        r += _rup(rows, 8)

    add("w1a", d_in1)
    add("w1b", d_in1)
    add("w2a", d_p1)
    add("w2b", d_p1)
    add("fc1", d_p2)
    in_f = fc1_out
    for j in range(n_hidden):
        add(f"hid{j}", in_f)
        in_f = n_units
    add("out", in_f)
    slab_rows = _rup(r, 8)
    vec_rows = _rup(6 + n_hidden, 8)

    return dict(K=K, stride=stride, pad=pad, C_in=C_in, C=C, L=L,
                L1=L1, L1p=L1p, L2=L2, L2p=L2p,
                n_hidden=n_hidden, n_units=n_units, fc1_out=fc1_out,
                out_dim=out_dim, cols=cols, offs=offs,
                slab_rows=slab_rows, vec_rows=vec_rows,
                d_in1=d_in1, d_p1=d_p1, d_p2=d_p2)


# ----------------------------------------------------------------------------
# Trace-time weight folding: Conv1d (+ zero padding, + layout flip) as a dense
# band matrix consuming a flattened input vector (built ONCE, with numpy).
# ----------------------------------------------------------------------------
def _conv_band(w, L_in, out_positions, *, K, stride, pad, pos_major_rows):
    """M such that (x_flat @ M)[j*C_out + o] == Conv1d(x)[out_positions[j], o].

    Input feature index:  i*L_in + t  (channel-major)  if not pos_major_rows
                          t*C_in + i  (position-major) if pos_major_rows
    Zero padding is encoded by simply omitting out-of-range taps.
    """
    w = np.asarray(w, np.float32)
    C_out, C_in, _ = w.shape
    M = np.zeros((C_in * L_in, len(out_positions) * C_out), np.float32)
    for j, l in enumerate(out_positions):
        for k in range(K):
            t = l * stride + k - pad
            if 0 <= t < L_in:
                rows = (t * C_in + np.arange(C_in)) if pos_major_rows \
                    else (np.arange(C_in) * L_in + t)
                M[rows, j * C_out:(j + 1) * C_out] = w[:, :, k].T
    return M


def prepare_params(params, cfg):
    """One-time parameter folding / packing (NOT part of the jitted forward)."""
    meta = _static_meta(cfg)
    K, stride, pad = meta["K"], meta["stride"], meta["pad"]
    C_in, C, L = meta["C_in"], meta["C"], meta["L"]
    L1p, L2p = meta["L1p"], meta["L2p"]
    n_hidden, n_units = meta["n_hidden"], meta["n_units"]
    fc1_out, out_dim, cols = meta["fc1_out"], meta["out_dim"], meta["cols"]
    offs = meta["offs"]
    g = lambda a: np.asarray(a, np.float32)

    # eval-mode BatchNorm + conv bias folded into per-channel (scale, shift);
    # the single bn module is shared by both conv layers (as in the PyTorch code)
    scale = g(params["bn_gamma"]) / np.sqrt(g(params["bn_var"]) + _EPS)
    shift1 = g(params["bn_beta"]) + (g(params["conv1_b"]) - g(params["bn_mean"])) * scale
    shift2 = g(params["bn_beta"]) + (g(params["conv2_b"]) - g(params["bn_mean"])) * scale

    wslab = np.zeros((meta["slab_rows"], cols), np.float32)

    def put(name, m):
        r0 = offs[name]
        wslab[r0:r0 + m.shape[0], :m.shape[1]] = m

    even1 = [2 * j for j in range(L1p)]
    odd1 = [2 * j + 1 for j in range(L1p)]
    even2 = [2 * j for j in range(L2p)]
    odd2 = [2 * j + 1 for j in range(L2p)]
    # conv1 consumes x in its ORIGINAL (channel-major) flattened layout
    put("w1a", _conv_band(params["conv1_w"], L, even1, K=K, stride=stride, pad=pad, pos_major_rows=False))
    put("w1b", _conv_band(params["conv1_w"], L, odd1, K=K, stride=stride, pad=pad, pos_major_rows=False))
    # conv2 consumes the pooled activations in position-major layout
    put("w2a", _conv_band(params["conv2_w"], L1p, even2, K=K, stride=stride, pad=pad, pos_major_rows=True))
    put("w2b", _conv_band(params["conv2_w"], L1p, odd2, K=K, stride=stride, pad=pad, pos_major_rows=True))

    linears = params["linears"]
    fc1_w, fc1_b = linears[0]
    # PyTorch flattens (B, C, L2p) channel-major; our activations are position-
    # major -> permute fc1 rows so the kernel needs no transpose/flatten at all.
    wt = g(fc1_w).T.reshape(C, L2p, fc1_out).transpose(1, 0, 2).reshape(L2p * C, fc1_out)
    put("fc1", wt)
    in_f = fc1_out
    for j in range(n_hidden):
        put(f"hid{j}", g(linears[1 + j][0]).T)  # torch (out,in) -> (in,out)
        in_f = n_units
    put("out", g(linears[-1][0]).T)             # zero-padded to full lane width

    vecs = np.zeros((meta["vec_rows"], cols), np.float32)
    vecs[0, :L1p * C] = np.tile(scale, L1p)     # layer-1 BN scale (per lane)
    vecs[1, :L1p * C] = np.tile(shift1, L1p)    # layer-1 BN shift (+conv bias)
    vecs[2, :L2p * C] = np.tile(scale, L2p)     # layer-2 BN scale
    vecs[3, :L2p * C] = np.tile(shift2, L2p)    # layer-2 BN shift (+conv bias)
    vecs[4, :fc1_out] = g(fc1_b)
    for j in range(n_hidden):
        vecs[5 + j, :n_units] = g(linears[1 + j][1])
    vecs[5 + n_hidden, :out_dim] = g(linears[-1][1])

    packed = {"vecs": jnp.asarray(vecs), "wslab": jnp.asarray(wslab)}
    return packed, meta


# ----------------------------------------------------------------------------
# The single fused kernel
# ----------------------------------------------------------------------------
def _make_fused_kernel(meta):
    offs, cols = meta["offs"], meta["cols"]
    d_in1, d_p1, d_p2 = meta["d_in1"], meta["d_p1"], meta["d_p2"]
    fc1_out, n_units, n_hidden = meta["fc1_out"], meta["n_units"], meta["n_hidden"]

    def kernel(x_ref, vecs_ref, wslab_ref, o_ref):
        x = x_ref[...]                                     # (B, C_in*L)

        def conv_block(h_in, wa_name, wb_name, w_in, w_out, s_row, t_row):
            # Conv1d(+pad) at even / odd output positions as two band matmuls,
            # then BN(eval)+ReLU, then MaxPool1d(2) as an elementwise max.
            wa = wslab_ref[offs[wa_name]:offs[wa_name] + w_in, 0:w_out]
            wb = wslab_ref[offs[wb_name]:offs[wb_name] + w_in, 0:w_out]
            s = vecs_ref[s_row:s_row + 1, 0:w_out]
            t = vecs_ref[t_row:t_row + 1, 0:w_out]
            ya = jnp.maximum(jnp.dot(h_in, wa, preferred_element_type=jnp.float32) * s + t, 0.0)
            yb = jnp.maximum(jnp.dot(h_in, wb, preferred_element_type=jnp.float32) * s + t, 0.0)
            return jnp.maximum(ya, yb)

        h = conv_block(x, "w1a", "w1b", d_in1, d_p1, 0, 1)   # (B, L1p*C)
        h = conv_block(h, "w2a", "w2b", d_p1, d_p2, 2, 3)    # (B, L2p*C)

        # fc1 (flatten + channel-major permutation folded into the weight rows;
        # NOTE: no activation after fc1 in the PyTorch forward).
        w = wslab_ref[offs["fc1"]:offs["fc1"] + d_p2, 0:fc1_out]
        h = jnp.dot(h, w, preferred_element_type=jnp.float32) + vecs_ref[4:5, 0:fc1_out]

        in_f = fc1_out
        for j in range(n_hidden):
            w = wslab_ref[offs[f"hid{j}"]:offs[f"hid{j}"] + in_f, 0:n_units]
            b = vecs_ref[5 + j:6 + j, 0:n_units]
            h = jnp.maximum(jnp.dot(h, w, preferred_element_type=jnp.float32) + b, 0.0)
            in_f = n_units
            # Dropout(p) is identity at inference (no RNG needed).

        # Final Linear, zero-padded to the full lane width -> unmasked store.
        w = wslab_ref[offs["out"]:offs["out"] + in_f, 0:cols]
        b = vecs_ref[5 + n_hidden:6 + n_hidden, 0:cols]
        o_ref[...] = (jnp.dot(h, w, preferred_element_type=jnp.float32) + b).astype(o_ref.dtype)

    return kernel


def cnn2_forward_pallas(x_ncl, packed, meta):
    B = x_ncl.shape[0]
    # Row-major trailing-dim merge: layout-preserving (free), keeps the original
    # (B, C_in, L) data untouched -- no standalone transpose HLO.
    x2 = x_ncl.reshape(B, meta["C_in"] * meta["L"]).astype(jnp.float32)
    out = pl.pallas_call(
        _make_fused_kernel(meta),
        out_shape=jax.ShapeDtypeStruct((B, meta["cols"]), jnp.float32),
        in_specs=[_VMEM, _VMEM, _VMEM],
        out_specs=_VMEM,
        # gridless at B=2 (review: add a "parallel" batch grid axis only when B grows)
    )(x2, packed["vecs"], packed["wslab"])
    return out[:, :meta["out_dim"]]


# ----------------------------------------------------------------------------
# Pure-JAX reference mirroring the PyTorch module (NCL layout) for verification
# ----------------------------------------------------------------------------
def cnn2_forward_reference(x_ncl, params, cfg):
    stride, padding = cfg["cnn_stride"], cfg["cnn_padding"]

    def conv1d(x, w, b):
        B, C_in, L = x.shape
        C_out, _, K = w.shape
        xp = jnp.pad(x, ((0, 0), (0, 0), (padding, padding)))
        L_out = (L - K + 2 * padding) // stride + 1
        cols = jnp.stack(
            [xp[:, :, k:k + stride * (L_out - 1) + 1:stride] for k in range(K)],
            axis=-1)                                        # (B, C_in, L_out, K)
        return jnp.einsum("bilk,oik->bol", cols, w) + b[None, :, None]

    def bn(x):
        scale = params["bn_gamma"] * jax.lax.rsqrt(params["bn_var"] + _EPS)
        return ((x - params["bn_mean"][None, :, None]) * scale[None, :, None]
                + params["bn_beta"][None, :, None])

    def pool2(x):
        B, C, L = x.shape
        Lp = L // 2
        return jnp.max(x[:, :, :Lp * 2].reshape(B, C, Lp, 2), axis=-1)

    h = pool2(jnp.maximum(bn(conv1d(x_ncl, params["conv1_w"], params["conv1_b"])), 0.0))
    h = pool2(jnp.maximum(bn(conv1d(h, params["conv2_w"], params["conv2_b"])), 0.0))
    h = h.reshape(h.shape[0], -1)                           # channel-major flatten
    linears = params["linears"]
    h = h @ linears[0][0].T + linears[0][1]                 # fc1 (no activation)
    for w, b in linears[1:-1]:
        h = jnp.maximum(h @ w.T + b, 0.0)
    w, b = linears[-1]
    return h @ w.T + b


if __name__ == "__main__":
    cfg = dict(input_dim=16, in_channels=4, output_dim=5, n_layers=2, n_units=32,
               dropout_prob=0.1, cnn_kernel=3, cnn_stride=1, cnn_padding=1,
               cnn_channel=8)
    C, Cin, K = cfg["cnn_channel"], cfg["in_channels"], cfg["cnn_kernel"]

    # same size bookkeeping as the PyTorch __init__
    conv_out = lambda L: (L - K + 2 * cfg["cnn_padding"]) // cfg["cnn_stride"] + 1
    L = cfg["input_dim"]
    L = conv_out(L) // 2
    L = conv_out(L) // 2
    fc1_in = C * L

    key = jax.random.PRNGKey(0)
    ks = jax.random.split(key, 20)
    params = {
        "conv1_w": 0.3 * jax.random.normal(ks[0], (C, Cin, K), jnp.float32),
        "conv1_b": 0.1 * jax.random.normal(ks[1], (C,), jnp.float32),
        "conv2_w": 0.3 * jax.random.normal(ks[2], (C, C, K), jnp.float32),
        "conv2_b": 0.1 * jax.random.normal(ks[3], (C,), jnp.float32),
        "bn_gamma": 1.0 + 0.1 * jax.random.normal(ks[4], (C,), jnp.float32),
        "bn_beta": 0.1 * jax.random.normal(ks[5], (C,), jnp.float32),
        "bn_mean": 0.1 * jax.random.normal(ks[6], (C,), jnp.float32),
        "bn_var": 1.0 + 0.1 * jnp.abs(jax.random.normal(ks[7], (C,), jnp.float32)),
    }
    dims = [(128, fc1_in)]                                  # fc1
    in_f = 128
    for _ in range(cfg["n_layers"]):
        dims.append((cfg["n_units"], in_f))
        in_f = cfg["n_units"]
    dims.append((cfg["output_dim"], in_f))
    linears, kidx = [], 8
    for (o, i) in dims:
        w = jax.random.normal(ks[kidx], (o, i), jnp.float32) / np.sqrt(i)
        b = 0.1 * jax.random.normal(ks[kidx + 1], (o,), jnp.float32)
        linears.append((w, b))
        kidx += 2
    params["linears"] = linears

    x = jax.random.normal(ks[18], (2, cfg["in_channels"], cfg["input_dim"]), jnp.float32)

    # one-time parameter folding/packing (cached outside the jitted forward)
    packed, meta = prepare_params(params, cfg)
    fwd = jax.jit(lambda xx, pk: cnn2_forward_pallas(xx, pk, meta))

    out = jax.block_until_ready(fwd(x, packed))
    ref = jax.block_until_ready(cnn2_forward_reference(x, params, cfg))
    assert out.shape == (2, cfg["output_dim"]), out.shape
    np.testing.assert_allclose(np.asarray(out), np.asarray(ref), rtol=1e-2, atol=1e-2)
    print("KERNEL_OK")
</pallas_src>

<mosaic_0001>
module attributes {stable_mosaic.version = 11 : i64} {
  func.func @kernel(%arg0: memref<2x64xf32, #tpu.memory_space<vmem>>, %arg1: memref<8x128xf32, #tpu.memory_space<vmem>>, %arg2: memref<480x128xf32, #tpu.memory_space<vmem>>, %arg3: memref<2x128xf32, #tpu.memory_space<vmem>>) attributes {dimension_semantics = [], scalar_prefetch = 0 : i64, scratch_operands = 0 : i64, tpu.core_type = #tpu.core_type<tc>} {
    %c0 = arith.constant 0 : index
    %c0_0 = arith.constant 0 : index
    %0 = vector.load %arg0[%c0, %c0_0] : memref<2x64xf32, #tpu.memory_space<vmem>>, vector<2x64xf32>
    %c0_1 = arith.constant 0 : index
    %c0_2 = arith.constant 0 : index
    %1 = vector.load %arg2[%c0_1, %c0_2] : memref<480x128xf32, #tpu.memory_space<vmem>>, vector<64x64xf32>
    %c64 = arith.constant 64 : index
    %c0_3 = arith.constant 0 : index
    %2 = vector.load %arg2[%c64, %c0_3] : memref<480x128xf32, #tpu.memory_space<vmem>>, vector<64x64xf32>
    %c0_4 = arith.constant 0 : index
    %c0_5 = arith.constant 0 : index
    %3 = vector.load %arg1[%c0_4, %c0_5] : memref<8x128xf32, #tpu.memory_space<vmem>>, vector<1x64xf32>
    %c1 = arith.constant 1 : index
    %c0_6 = arith.constant 0 : index
    %4 = vector.load %arg1[%c1, %c0_6] : memref<8x128xf32, #tpu.memory_space<vmem>>, vector<1x64xf32>
    %cst = arith.constant dense<0.000000e+00> : vector<2x64xf32>
    %5 = tpu.matmul %0, %1, %cst {dimension_numbers = #tpu.dot_dimension_numbers<[1], [0], [0], [1], [0, 0, 1, 1], [], []>} : vector<2x64xf32>, vector<64x64xf32>, vector<2x64xf32> -> vector<2x64xf32>
    %6 = vector.broadcast %3 : vector<1x64xf32> to vector<2x64xf32>
    %7 = arith.mulf %5, %6 : vector<2x64xf32>
    %8 = vector.broadcast %4 : vector<1x64xf32> to vector<2x64xf32>
    %9 = arith.addf %7, %8 : vector<2x64xf32>
    %cst_7 = arith.constant 0.000000e+00 : f32
    %10 = vector.broadcast %cst_7 : f32 to vector<2x64xf32>
    %11 = arith.maximumf %9, %10 : vector<2x64xf32>
    %cst_8 = arith.constant dense<0.000000e+00> : vector<2x64xf32>
    %12 = tpu.matmul %0, %2, %cst_8 {dimension_numbers = #tpu.dot_dimension_numbers<[1], [0], [0], [1], [0, 0, 1, 1], [], []>} : vector<2x64xf32>, vector<64x64xf32>, vector<2x64xf32> -> vector<2x64xf32>
    %13 = vector.broadcast %3 : vector<1x64xf32> to vector<2x64xf32>
    %14 = arith.mulf %12, %13 : vector<2x64xf32>
    %15 = vector.broadcast %4 : vector<1x64xf32> to vector<2x64xf32>
    %16 = arith.addf %14, %15 : vector<2x64xf32>
    %cst_9 = arith.constant 0.000000e+00 : f32
    %17 = vector.broadcast %cst_9 : f32 to vector<2x64xf32>
    %18 = arith.maximumf %16, %17 : vector<2x64xf32>
    %19 = arith.maximumf %11, %18 : vector<2x64xf32>
    %c128 = arith.constant 128 : index
    %c0_10 = arith.constant 0 : index
    %20 = vector.load %arg2[%c128, %c0_10] : memref<480x128xf32, #tpu.memory_space<vmem>>, vector<64x32xf32>
    %c192 = arith.constant 192 : index
    %c0_11 = arith.constant 0 : index
    %21 = vector.load %arg2[%c192, %c0_11] : memref<480x128xf32, #tpu.memory_space<vmem>>, vector<64x32xf32>
    %c2 = arith.constant 2 : index
    %c0_12 = arith.constant 0 : index
    %22 = vector.load %arg1[%c2, %c0_12] : memref<8x128xf32, #tpu.memory_space<vmem>>, vector<1x32xf32>
    %c3 = arith.constant 3 : index
    %c0_13 = arith.constant 0 : index
    %23 = vector.load %arg1[%c3, %c0_13] : memref<8x128xf32, #tpu.memory_space<vmem>>, vector<1x32xf32>
    %cst_14 = arith.constant dense<0.000000e+00> : vector<2x32xf32>
    %24 = tpu.matmul %19, %20, %cst_14 {dimension_numbers = #tpu.dot_dimension_numbers<[1], [0], [0], [1], [0, 0, 1, 1], [], []>} : vector<2x64xf32>, vector<64x32xf32>, vector<2x32xf32> -> vector<2x32xf32>
    %25 = vector.broadcast %22 : vector<1x32xf32> to vector<2x32xf32>
    %26 = arith.mulf %24, %25 : vector<2x32xf32>
    %27 = vector.broadcast %23 : vector<1x32xf32> to vector<2x32xf32>
    %28 = arith.addf %26, %27 : vector<2x32xf32>
    %cst_15 = arith.constant 0.000000e+00 : f32
    %29 = vector.broadcast %cst_15 : f32 to vector<2x32xf32>
    %30 = arith.maximumf %28, %29 : vector<2x32xf32>
    %cst_16 = arith.constant dense<0.000000e+00> : vector<2x32xf32>
    %31 = tpu.matmul %19, %21, %cst_16 {dimension_numbers = #tpu.dot_dimension_numbers<[1], [0], [0], [1], [0, 0, 1, 1], [], []>} : vector<2x64xf32>, vector<64x32xf32>, vector<2x32xf32> -> vector<2x32xf32>
    %32 = vector.broadcast %22 : vector<1x32xf32> to vector<2x32xf32>
    %33 = arith.mulf %31, %32 : vector<2x32xf32>
    %34 = vector.broadcast %23 : vector<1x32xf32> to vector<2x32xf32>
    %35 = arith.addf %33, %34 : vector<2x32xf32>
    %cst_17 = arith.constant 0.000000e+00 : f32
    %36 = vector.broadcast %cst_17 : f32 to vector<2x32xf32>
    %37 = arith.maximumf %35, %36 : vector<2x32xf32>
    %38 = arith.maximumf %30, %37 : vector<2x32xf32>
    %c256 = arith.constant 256 : index
    %c0_18 = arith.constant 0 : index
    %39 = vector.load %arg2[%c256, %c0_18] : memref<480x128xf32, #tpu.memory_space<vmem>>, vector<32x128xf32>
    %cst_19 = arith.constant dense<0.000000e+00> : vector<2x128xf32>
    %40 = tpu.matmul %38, %39, %cst_19 {dimension_numbers = #tpu.dot_dimension_numbers<[1], [0], [0], [1], [0, 0, 1, 1], [], []>} : vector<2x32xf32>, vector<32x128xf32>, vector<2x128xf32> -> vector<2x128xf32>
    %c4 = arith.constant 4 : index
    %c0_20 = arith.constant 0 : index
    %41 = vector.load %arg1[%c4, %c0_20] : memref<8x128xf32, #tpu.memory_space<vmem>>, vector<1x128xf32>
    %42 = vector.broadcast %41 : vector<1x128xf32> to vector<2x128xf32>
    %43 = arith.addf %40, %42 : vector<2x128xf32>
    %c288 = arith.constant 288 : index
    %c0_21 = arith.constant 0 : index
    %44 = vector.load %arg2[%c288, %c0_21] : memref<480x128xf32, #tpu.memory_space<vmem>>, vector<128x32xf32>
    %c5 = arith.constant 5 : index
    %c0_22 = arith.constant 0 : index
    %45 = vector.load %arg1[%c5, %c0_22] : memref<8x128xf32, #tpu.memory_space<vmem>>, vector<1x32xf32>
    %cst_23 = arith.constant dense<0.000000e+00> : vector<2x32xf32>
    %46 = tpu.matmul %43, %44, %cst_23 {dimension_numbers = #tpu.dot_dimension_numbers<[1], [0], [0], [1], [0, 0, 1, 1], [], []>} : vector<2x128xf32>, vector<128x32xf32>, vector<2x32xf32> -> vector<2x32xf32>
    %47 = vector.broadcast %45 : vector<1x32xf32> to vector<2x32xf32>
    %48 = arith.addf %46, %47 : vector<2x32xf32>
    %cst_24 = arith.constant 0.000000e+00 : f32
    %49 = vector.broadcast %cst_24 : f32 to vector<2x32xf32>
    %50 = arith.maximumf %48, %49 : vector<2x32xf32>
    %c416 = arith.constant 416 : index
    %c0_25 = arith.constant 0 : index
    %51 = vector.load %arg2[%c416, %c0_25] : memref<480x128xf32, #tpu.memory_space<vmem>>, vector<32x32xf32>
    %c6 = arith.constant 6 : index
    %c0_26 = arith.constant 0 : index
    %52 = vector.load %arg1[%c6, %c0_26] : memref<8x128xf32, #tpu.memory_space<vmem>>, vector<1x32xf32>
    %cst_27 = arith.constant dense<0.000000e+00> : vector<2x32xf32>
    %53 = tpu.matmul %50, %51, %cst_27 {dimension_numbers = #tpu.dot_dimension_numbers<[1], [0], [0], [1], [0, 0, 1, 1], [], []>} : vector<2x32xf32>, vector<32x32xf32>, vector<2x32xf32> -> vector<2x32xf32>
    %54 = vector.broadcast %52 : vector<1x32xf32> to vector<2x32xf32>
    %55 = arith.addf %53, %54 : vector<2x32xf32>
    %cst_28 = arith.constant 0.000000e+00 : f32
    %56 = vector.broadcast %cst_28 : f32 to vector<2x32xf32>
    %57 = arith.maximumf %55, %56 : vector<2x32xf32>
    %c448 = arith.constant 448 : index
    %c0_29 = arith.constant 0 : index
    %58 = vector.load %arg2[%c448, %c0_29] : memref<480x128xf32, #tpu.memory_space<vmem>>, vector<32x128xf32>
    %c7 = arith.constant 7 : index
    %c0_30 = arith.constant 0 : index
    %59 = vector.load %arg1[%c7, %c0_30] : memref<8x128xf32, #tpu.memory_space<vmem>>, vector<1x128xf32>
    %cst_31 = arith.constant dense<0.000000e+00> : vector<2x128xf32>
    %60 = tpu.matmul %57, %58, %cst_31 {dimension_numbers = #tpu.dot_dimension_numbers<[1], [0], [0], [1], [0, 0, 1, 1], [], []>} : vector<2x32xf32>, vector<32x128xf32>, vector<2x128xf32> -> vector<2x128xf32>
    %61 = vector.broadcast %59 : vector<1x128xf32> to vector<2x128xf32>
    %62 = arith.addf %60, %61 : vector<2x128xf32>
    %c0_32 = arith.constant 0 : index
    %c0_33 = arith.constant 0 : index
    %63 = vector.load %arg3[%c0_32, %c0_33] : memref<2x128xf32, #tpu.memory_space<vmem>>, vector<2x128xf32>
    tpu.vector_store %arg3[%c0_32, %c0_33], %62 {strides = array<i32>} : memref<2x128xf32, #tpu.memory_space<vmem>>, vector<2x128xf32>,
    return
  }
}

</mosaic_0001>

<bundles_post_ra>
// kernel: _lambda_.1
= control target key start
LH: loop header
LB: loop body
LE: loop exit
PB: predicated region body
PF: predicated region fallthrough
CT: control target
= control target key end

     0   :  { %8 = vsyncpa [#allocation3], 0  ;;  %s454_s0 = inlined_call_operand.vmem [shape: f32[2,64], index: 0, kind: input, shape index: {}]   ;;  %s455_s1 = inlined_call_operand.vmem [shape: f32[8,128], index: 1, kind: input, shape index: {}]   ;;  %s456_s2 = inlined_call_operand.hbm [shape: f32[480,128], index: 2, kind: input, shape index: {}]   ;;  %s457_s3 = inlined_call_operand.hbm [shape: f32[2,128], index: 3, kind: output, shape index: {}]  }
   0x1   :  { %9 = vsyncpa [#allocation4], 0  ;;  %s18_s14 = sshll.u32 %s456_s2, 4  ;;  %s390_s15 = smov [#allocation2]   ;;  %s19_s14 = int_to_ptr.hbm [resolvable:$true] %s18_s14 }
   0x2   :  { %s20_s16 = sshll.u32 %s390_s15, 4  ;;  %s391_s17 = smov 128   ;;  %s21_s16 = int_to_ptr.vmem [resolvable:$true] %s20_s16 }
   0x3   :  { %s392_s18 = smov 8  }
   0x4   :  { %26 = dma.hbm_to_vmem [thread:$0]  %s19_s14, 7680, %s21_s16, [#allocation3], %s391_s17, %s391_s17, %s392_s18  }
   0x5   :  { %386 = dma.done.wait [#allocation3], 7680  }
   0x6   :  { %387 = vsyncadd [#allocation3], 4294959616  ;;  %v39_v0 = vld [vmem:[#allocation2 + $0x38] sm:$0xff]  ;;  %v38_v1 = vld [vmem:[#allocation2 + $0x30] sm:$0xff]  ;;  %vm50_vm0 = vcmask 523264   ;;  %vm179_vm1 = vcmask 261120  }
   0x7   :  { %62 = vmatpush.msra.mxu0 %v39_v0  ;;  %v37_v2 = vld [vmem:[#allocation2 + $0x28] sm:$0xff]  ;;  %v36_v3 = vld [vmem:[#allocation2 + $0x20] sm:$0xff]  ;;  %v35_v4 = vld [vmem:[#allocation2 + $0x18] sm:$0xff]  ;;  %s393_s8 = smov [#allocation5]   ;;  %s309_s12 = sshll.u32 %s457_s3, 4  ;;  %s310_s12 = int_to_ptr.hbm [resolvable:$true] %s309_s12 }
   0x8   :  { %v34_v5 = vld [vmem:[#allocation2 + $0x10] sm:$0xff]  ;;  %v33_v6 = vld [vmem:[#allocation2 + $0x8] sm:$0xff]  ;;  %v32_v7 = vld [vmem:[#allocation2] sm:$0xff]  ;;  %s307_s9 = sshll.u32 %s393_s8, 4  ;;  %s308_s9 = int_to_ptr.vmem [resolvable:$true] %s307_s9 }
   0x9   :  { %63 = vmatpush.msra.mxu0 %v38_v1  ;;  %v47_v8 = vld [vmem:[#allocation2 + $0x78] sm:$0xff]  ;;  %v31_v9 = vld [vmem:[%s454_s0] sm:$0x3]  ;;  %v46_v10 = vld [vmem:[#allocation2 + $0x70] sm:$0xff] }
   0xa   :  { %v45_v11 = vld [vmem:[#allocation2 + $0x68] sm:$0xff]  ;;  %v44_v12 = vld [vmem:[#allocation2 + $0x60] sm:$0xff]  ;;  %v43_v13 = vld [vmem:[#allocation2 + $0x58] sm:$0xff] }
   0xb   :  { %64 = vmatpush.msra.mxu0 %v37_v2  ;;  %v42_v14 = vld [vmem:[#allocation2 + $0x50] sm:$0xff]  ;;  %v41_v15 = vld [vmem:[#allocation2 + $0x48] sm:$0xff]  ;;  %v40_v16 = vld [vmem:[#allocation2 + $0x40] sm:$0xff] }
   0xc   :  { %v110_v17 = vld [vmem:[#allocation2 + $0xb8] sm:$0xff]  ;;  %v109_v19 = vld [vmem:[#allocation2 + $0xb0] sm:$0xff]  ;;  %v108_v21 = vld [vmem:[#allocation2 + $0xa8] sm:$0xff] }
   0xd   :  { %65 = vmatpush.msra.mxu0 %v36_v3  ;;  %v118_v18 = vld [vmem:[#allocation2 + $0xf8] sm:$0xff]  ;;  %132 = vmatpush.msra.mxu2 %v110_v17  ;;  %v117_v20 = vld [vmem:[#allocation2 + $0xf0] sm:$0xff]  ;;  %v116_v22 = vld [vmem:[#allocation2 + $0xe8] sm:$0xff] }
   0xe   :  { %157 = vmatpush.msra.mxu3 %v118_v18  ;;  %v107_v23 = vld [vmem:[#allocation2 + $0xa0] sm:$0xff]  ;;  %v106_v25 = vld [vmem:[#allocation2 + $0x98] sm:$0xff]  ;;  %v105_v27 = vld [vmem:[#allocation2 + $0x90] sm:$0xff] }
   0xf   :  { %66 = vmatpush.msra.mxu0 %v35_v4  ;;  %133 = vmatpush.msra.mxu2 %v109_v19  ;;  %v115_v24 = vld [vmem:[#allocation2 + $0xe0] sm:$0xff]  ;;  %v114_v26 = vld [vmem:[#allocation2 + $0xd8] sm:$0xff]  ;;  %v113_v28 = vld [vmem:[#allocation2 + $0xd0] sm:$0xff] }
  0x10   :  { %158 = vmatpush.msra.mxu3 %v117_v20  ;;  %v104_v29 = vld [vmem:[#allocation2 + $0x88] sm:$0xff]  ;;  %v103_v31 = vld [vmem:[#allocation2 + $0x80] sm:$0xff]  ;;  %v176_v44 = vld [vmem:[#allocation2 + $0x118] sm:$0xff] }
  0x11   :  { %67 = vmatpush.msra.mxu0 %v34_v5  ;;  %134 = vmatpush.msra.mxu2 %v108_v21  ;;  %v112_v30 = vld [vmem:[#allocation2 + $0xc8] sm:$0xff]  ;;  %v111_v32 = vld [vmem:[#allocation2 + $0xc0] sm:$0xff]  ;;  %v175_v45 = vld [vmem:[#allocation2 + $0x110] sm:$0xff] }
  0x12   :  { %159 = vmatpush.msra.mxu3 %v116_v22  ;;  %v330_v34 = vld [vmem:[%s455_s1] ss:$0 sm:$0xff]  ;;  %v331_v36 = vld [vmem:[%s455_s1 + $0x1] ss:$0 sm:$0xff]  ;;  %v174_v46 = vld [vmem:[#allocation2 + $0x108] sm:$0xff] }
  0x13   :  { %68 = vmatpush.msra.mxu0 %v33_v6  ;;  %135 = vmatpush.msra.mxu2 %v107_v23  ;;  %v173_v47 = vld [vmem:[#allocation2 + $0x100] sm:$0xff]  ;;  %v218_v48 = vld [vmem:[#allocation2 + $0x198] sm:$0xff]  ;;  %v217_v49 = vld [vmem:[#allocation2 + $0x190] sm:$0xff] }
  0x14   :  { %160 = vmatpush.msra.mxu3 %v115_v24  ;;  %221 = vmatpush.msra.mxu1 %v218_v48  ;;  %v216_v50 = vld [vmem:[#allocation2 + $0x188] sm:$0xff]  ;;  %v215_v51 = vld [vmem:[#allocation2 + $0x180] sm:$0xff]  ;;  %v214_v52 = vld [vmem:[#allocation2 + $0x178] sm:$0xff] }
  0x15   :  { %69 = vmatpush.msra.mxu0 %v32_v7  ;;  %136 = vmatpush.msra.mxu2 %v106_v25  ;;  %v213_v53 = vld [vmem:[#allocation2 + $0x170] sm:$0xff]  ;;  %v212_v54 = vld [vmem:[#allocation2 + $0x168] sm:$0xff]  ;;  %v211_v55 = vld [vmem:[#allocation2 + $0x160] sm:$0xff] }
  0x16   :  { %319 = vmatmul.msk.f32.vlgmr.msra.gmra.mxu0 %vm50_vm0, %v31_v9  ;;  %161 = vmatpush.msra.mxu3 %v114_v26  ;;  %v210_v56 = vld [vmem:[#allocation2 + $0x158] sm:$0xff]  ;;  %v209_v57 = vld [vmem:[#allocation2 + $0x150] sm:$0xff]  ;;  %v208_v58 = vld [vmem:[#allocation2 + $0x148] sm:$0xff] }
  0x17   :  { %87 = vmatpush.msrb.mxu0 %v47_v8  ;;  %137 = vmatpush.msra.mxu2 %v105_v27  ;;  %v332_v59 = vld [vmem:[%s455_s1 + $0x2] ss:$0 sm:$0xff]  ;;  %v333_v61 = vld [vmem:[%s455_s1 + $0x3] ss:$0 sm:$0xff]  ;;  %v206_v62 = vld [vmem:[#allocation2 + $0x138] sm:$0xff] }
  0x18   :  { %162 = vmatpush.msra.mxu3 %v113_v28  ;;  %222 = vmatpush.msra.mxu1 %v217_v49  ;;  %v207_v60 = vld [vmem:[#allocation2 + $0x140] sm:$0xff]  ;;  %v205_v3 = vld [vmem:[#allocation2 + $0x130] sm:$0xff]  ;;  %v275_v18 = vld [vmem:[#allocation2 + $0x1d8] sm:$0xff] }
  0x19   :  { %88 = vmatpush.msrb.mxu0 %v46_v10  ;;  %138 = vmatpush.msra.mxu2 %v104_v29  ;;  %v203_v10 = vld [vmem:[#allocation2 + $0x120] sm:$0xff]  ;;  %v274_v19 = vld [vmem:[#allocation2 + $0x1d0] sm:$0xff]  ;;  %v273_v24 = vld [vmem:[#allocation2 + $0x1c8] sm:$0xff] }
  0x1a   :  { %163 = vmatpush.msra.mxu3 %v112_v30  ;;  %223 = vmatpush.msra.mxu1 %v216_v50  ;;  %v242_v17 = vld [vmem:[#allocation2 + $0x1a0] sm:$0xff] }
  0x1b   :  { %89 = vmatpush.msrb.mxu0 %v45_v11  ;;  %139 = vmatpush.msra.mxu2 %v103_v31  ;;  %v245_v11 = vld [vmem:[#allocation2 + $0x1b8] sm:$0xff]  ;;  %v335_v20 = vld [vmem:[%s455_s1 + $0x5] ss:$0 sm:$0xff]  ;;  %v336_v26 = vld [vmem:[%s455_s1 + $0x6] ss:$0 sm:$0xff] }
  0x1c   :  { %164 = vmatpush.msra.mxu3 %v111_v32  ;;  %224 = vmatpush.msra.mxu1 %v215_v51  ;;  %v272_v25 = vld [vmem:[#allocation2 + $0x1c0] sm:$0xff] }
  0x1d   :  { %90 = vmatpush.msrb.mxu0 %v44_v12  ;;  %195 = vmatpush.msrb.mxu2 %v176_v44  ;;  %v244_v12 = vld [vmem:[#allocation2 + $0x1b0] sm:$0xff]  ;;  %v337_v30 = vld [vmem:[%s455_s1 + $0x7] ss:$0 sm:$0xff] }
  0x1e   :  { %225 = vmatpush.msra.mxu1 %v214_v52  ;;  %293 = vmatpush.msrb.mxu3 %v275_v18 }
  0x1f   :  { %91 = vmatpush.msrb.mxu0 %v43_v13  ;;  %196 = vmatpush.msrb.mxu2 %v175_v45  ;;  %v334_v13 = vld [vmem:[%s455_s1 + $0x4] ss:$0 sm:$0xff] }
  0x20   :  { %226 = vmatpush.msra.mxu1 %v213_v53  ;;  %294 = vmatpush.msrb.mxu3 %v274_v19 }
  0x21   :  { %92 = vmatpush.msrb.mxu0 %v42_v14  ;;  %197 = vmatpush.msrb.mxu2 %v174_v46 }
  0x22   :  { %227 = vmatpush.msra.mxu1 %v212_v54  ;;  %295 = vmatpush.msrb.mxu3 %v273_v24 }
  0x23   :  { %93 = vmatpush.msrb.mxu0 %v41_v15  ;;  %198 = vmatpush.msrb.mxu2 %v173_v47 }
  0x24   :  { %228 = vmatpush.msra.mxu1 %v211_v55  ;;  %296 = vmatpush.msrb.mxu3 %v272_v25 }
  0x25   :  { %94 = vmatpush.msrb.mxu0 %v40_v16  ;;  %v243_v16 = vld [vmem:[#allocation2 + $0x1a8] sm:$0xff] }
  0x26   :  { %320 = vmatmul.msk.f32.vlgmr.msrb.gmra.mxu0 %vm50_vm0, %v31_v9  ;;  %229 = vmatpush.msra.mxu1 %v210_v56  ;;  %v204_v9 = vld [vmem:[#allocation2 + $0x128] sm:$0xff] }
  0x28   :  { %230 = vmatpush.msra.mxu1 %v209_v57 }
  0x2a   :  { %231 = vmatpush.msra.mxu1 %v208_v58 }
  0x2c   :  { %232 = vmatpush.msra.mxu1 %v207_v60 }
  0x2e   :  { %233 = vmatpush.msra.mxu1 %v206_v62 }
  0x30   :  { %234 = vmatpush.msra.mxu1 %v205_v3 }
  0x32   :  { %235 = vmatpush.msra.mxu1 %v204_v9 }
  0x34   :  { %236 = vmatpush.msra.mxu1 %v203_v10 }
  0x93   :  { %v71_v33 = vpop.f32.mrf.mxu0 }
  0x94   :  { %v75_v35 = vmul.f32 %v330_v34, %v71_v33 }
  0x96   :  { %v77_v38 = vadd.f32 %v331_v36, %v75_v35 }
  0x98   :  { %v78_v41 = vmax.f32 %v77_v38, 0.0 }
  0xa3   :  { %v96_v37 = vpop.f32.mrf.mxu0 }
  0xa4   :  { %v99_v39 = vmul.f32 %v330_v34, %v96_v37 }
  0xa6   :  { %v100_v40 = vadd.f32 %v331_v36, %v99_v39 }
  0xa8   :  { %v101_v42 = vmax.f32 %v100_v40, 0.0 }
  0xaa   :  { %v102_v43 = vmax.f32 %v78_v41, %v101_v42 }
  0xac   :  { %321 = vmatmul.msk.f32.vlgmr.msra.gmra.mxu2 %vm50_vm0, %v102_v43  ;;  %322 = vmatmul.msk.f32.vlgmr.msra.gmra.mxu3 %vm50_vm0, %v102_v43 }
  0xad   :  { %263 = vmatpush.msra.mxu2 %v245_v11 }
  0xaf   :  { %264 = vmatpush.msra.mxu2 %v244_v12 }
  0xb1   :  { %265 = vmatpush.msra.mxu2 %v243_v16 }
  0xb3   :  { %266 = vmatpush.msra.mxu2 %v242_v17 }
 0x12f   :  { %v141_v63 = vpop.f32.mrf.mxu2  ;;  %v166_v0 = vpop.f32.mrf.mxu3 }
 0x130   :  { %v145_v1 = vmul.f32 %v332_v59, %v141_v63  ;;  %v169_v2 = vmul.f32 %v332_v59, %v166_v0 }
 0x132   :  { %v147_v4 = vadd.f32 %v333_v61, %v145_v1  ;;  %v170_v5 = vadd.f32 %v333_v61, %v169_v2 }
 0x134   :  { %v148_v6 = vmax.f32 %v147_v4, 0.0  ;;  %v171_v7 = vmax.f32 %v170_v5, 0.0 }
 0x136   :  { %v172_v8 = vmax.f32 %v148_v6, %v171_v7 }
 0x138   :  { %323 = vmatmul.msk.f32.vlgmr.msrb.gmra.mxu2 %vm179_vm1, %v172_v8 }
 0x1bb   :  { %v200_v14 = vpop.f32.mrf.mxu2 }
 0x1bc   :  { %v201_v15 = vadd.f32 %v334_v13, %v200_v14 }
 0x1be   :  { %237 = vmatmul.f32.vlgmr.msra.gmra.mxu1 %v201_v15 }
 0x23b   :  { %v238_v21 = vpop.f32.mrf.mxu1 }
 0x23c   :  { %v239_v22 = vadd.f32 %v335_v20, %v238_v21 }
 0x23e   :  { %v241_v23 = vmax.f32 %v239_v22, 0.0 }
 0x240   :  { %324 = vmatmul.msk.f32.vlgmr.msra.gmra.mxu2 %vm179_vm1, %v241_v23 }
 0x2c3   :  { %v268_v27 = vpop.f32.mrf.mxu2 }
 0x2c4   :  { %v269_v28 = vadd.f32 %v336_v26, %v268_v27 }
 0x2c6   :  { %v271_v29 = vmax.f32 %v269_v28, 0.0 }
 0x2c8   :  { %325 = vmatmul.msk.f32.vlgmr.msrb.gmra.mxu3 %vm179_vm1, %v271_v29 }
 0x34b   :  { %v298_v31 = vpop.f32.mrf.mxu3 }
 0x34c   :  { %v299_v32 = vadd.f32 %v337_v30, %v298_v31 }
 0x34e   :  { %301 = vst [vmem:[#allocation5] sm:$0x3] %v299_v32 }
 0x34f   :  { %312 = dma.vmem_to_hbm [thread:$0]  %s308_s9, 32, %s310_s12, [#allocation4]  }
 0x350   :  { %388 = dma.done.wait [#allocation4], 32  }
 0x351   :  { %389 = vsyncadd [#allocation4], 4294967264 }
 0x352   :  { %317 = vsyncpa [#allocation3], 1 }
 0x353   :  { %318 = vsyncpa [#allocation4], 1 }

</bundles_post_ra>
